<compile_context>
chip_gen: v7x
topology: tpu7x:2x2x1
jax: 0.10.0
libtpu: 0.0.40
codegen_flags: <defaults>
</compile_context>

<pallas_src>
import jax
import jax.numpy as jnp
from jax.experimental import pallas as pl
from jax.experimental.pallas import tpu as pltpu

EMB_DIM = 512
NUM_CLASSES = 2
PAD_OUT = 128          # lane-dense output width (>= NUM_CLASSES, multiple of 128)


def felix_kernel(x_ref, wbig_ref, bf_ref, wc_ref, bc_ref, out_ref):
    """Fused: (pool+proj) matmul -> L2 norm (folded) -> linear(512, 128pad).

    x_ref   : (TN, C*HW)        f32/bf16  lane-dense input tile (streamed)
    wbig_ref: (C*HW, 512)       bf16      pooling folded into projection (resident)
    bf_ref  : (1, 512)          f32       stand-in backbone bias (resident)
    wc_ref  : (512, PAD_OUT)    bf16      classifier weight, zero-padded (resident)
    bc_ref  : (1, PAD_OUT)      f32       classifier bias,   zero-padded (resident)
    out_ref : (TN, PAD_OUT)     f32       lane-dense logits slab (cols >=2 are zero)
    """
    # Pool + C->512 projection as a single MXU matmul (bf16 in, f32 accumulate).
    x = x_ref[...].astype(jnp.bfloat16)
    feat = jnp.dot(x, wbig_ref[...],
                   preferred_element_type=jnp.float32) + bf_ref[...]   # (TN, 512)

    # L2-normalize is a per-row scalar -> fold it after the narrow matmul:
    #   (feat * inv_norm) @ Wc + bc == inv_norm * (feat @ Wc) + bc
    inv_norm = jax.lax.rsqrt(
        jnp.sum(feat * feat, axis=-1, keepdims=True) + 1e-12)          # (TN, 1) EUP

    t = jnp.dot(feat.astype(jnp.bfloat16), wc_ref[...],
                preferred_element_type=jnp.float32)                    # (TN, 128)
    out_ref[...] = inv_norm * t + bc_ref[...]      # lane-dense (128-wide) store


def _pick_tiling(n, chw, x_bytes):
    """Return (tn, vmem_limit_bytes) with honest VMEM accounting.

    Accounts for: double-buffered lane-dense x tile, double-buffered output
    tile, feat/t intermediates, and the resident bf16 weights.  Sizes against
    the physical VMEM of the current generation (v7x: 64 MiB/TC, v5e/v6e:
    128 MiB) instead of scoped defaults, and prefers an even, balanced number
    of tiles so both v7x TensorCores get work.
    """
    resident = chw * EMB_DIM * 2 + EMB_DIM * PAD_OUT * 2 + (EMB_DIM + PAD_OUT) * 4
    # per-row bytes: 2x x tile + 2x out tile + feat(f32)+feat(bf16)+t(f32) scratch
    per_row = 2 * chw * x_bytes + 2 * PAD_OUT * 4 + EMB_DIM * 6 + PAD_OUT * 4

    try:
        cap = int(pltpu.get_tpu_info().vmem_capacity_bytes)
    except Exception:
        cap = 64 * 1024 * 1024                       # conservative (v7x-sized)
    budget = min(cap // 2, 48 * 1024 * 1024)         # headroom for compiler scratch
    tile_budget = max(per_row * 8, budget - resident)

    tn_cap = max(8, min(1024, (tile_budget // per_row) // 8 * 8))

    if n <= 16:
        tn = n                                       # tiny batch: single full block
        num_tiles = 1
    else:
        num_tiles = max(2, -(-n // tn_cap))          # >=2 tiles -> both TCs busy
        if num_tiles % 2:
            num_tiles += 1                           # even tile count for v7x balance
        tn = -(-(-(-n // num_tiles)) // 8) * 8       # ceil(n/num_tiles) rounded to 8

    needed = resident + per_row * tn + 4 * 1024 * 1024
    vmem_limit = int(min(cap - 4 * 1024 * 1024, max(needed, 32 * 1024 * 1024)))
    return tn, vmem_limit


def felix_classifier(x_nchw, w_feat, b_feat, w_cls, b_cls):
    """Wrapper: NCHW -> (N, C*HW) lane-dense reshape (free), batch-gridded
    Pallas call, lane-dense padded output sliced back to (N, 2)."""
    N, C, H, W = x_nchw.shape
    HW = H * W
    CHW = C * HW
    # Lane-dense input slab.  NOTE: no dtype cast inserted here — if the
    # upstream producer emits bf16, it streams half the bytes automatically.
    x2 = x_nchw.reshape(N, CHW)
    x_bytes = 2 if x2.dtype == jnp.bfloat16 else 4

    # Pooling folded into the projection: Wbig[c*HW + j, :] = w_feat[c, :] / HW.
    wbig = jnp.repeat(w_feat.astype(jnp.float32) / float(HW), HW,
                      axis=0).astype(jnp.bfloat16)                    # (CHW, 512)
    bf = b_feat.astype(jnp.float32).reshape(1, EMB_DIM)

    # Lane-dense classifier: pad to 128 output lanes with EXACT zeros so the
    # padded logit columns are identically zero and can be sliced off safely.
    wc_pad = jnp.zeros((EMB_DIM, PAD_OUT), jnp.bfloat16).at[:, :NUM_CLASSES].set(
        w_cls.astype(jnp.bfloat16))
    bc_pad = jnp.zeros((1, PAD_OUT), jnp.float32).at[:, :NUM_CLASSES].set(
        b_cls.astype(jnp.float32).reshape(1, NUM_CLASSES))

    tn, vmem_limit = _pick_tiling(N, CHW, x_bytes)
    grid = (pl.cdiv(N, tn),)

    out_padded = pl.pallas_call(
        felix_kernel,
        out_shape=jax.ShapeDtypeStruct((N, PAD_OUT), jnp.float32),
        grid=grid,
        in_specs=[
            # x: streamed per batch tile (double-buffered by the pipeline).
            pl.BlockSpec((tn, CHW), lambda i: (i, 0)),
            # weights / biases: grid-invariant index_maps -> DMA'd once, resident.
            pl.BlockSpec((CHW, EMB_DIM), lambda i: (0, 0)),
            pl.BlockSpec((1, EMB_DIM), lambda i: (0, 0)),
            pl.BlockSpec((EMB_DIM, PAD_OUT), lambda i: (0, 0)),
            pl.BlockSpec((1, PAD_OUT), lambda i: (0, 0)),
        ],
        out_specs=pl.BlockSpec((tn, PAD_OUT), lambda i: (i, 0)),
        compiler_params=pltpu.CompilerParams(
            dimension_semantics=("parallel",),      # shard batch tiles across TCs (v7x)
            vmem_limit_bytes=vmem_limit,
        ),
        cost_estimate=pl.CostEstimate(
            flops=2 * N * (CHW * EMB_DIM + EMB_DIM * PAD_OUT),
            transcendentals=N,
            bytes_accessed=(x2.size * x_bytes + wbig.size * 2 + wc_pad.size * 2
                            + bf.size * 4 + bc_pad.size * 4 + N * PAD_OUT * 4),
        ),
    )(x2, wbig, bf, wc_pad, bc_pad)

    return out_padded[:, :NUM_CLASSES]


if __name__ == "__main__":
    key = jax.random.PRNGKey(0)
    kx, k1, k2, k3, k4 = jax.random.split(key, 5)

    # Small shapes consistent with an image-classifier forward pass.
    N, C, H, W = 2, 4, 16, 16
    x = jax.random.normal(kx, (N, C, H, W), dtype=jnp.float32)

    # Deterministic synthetic parameters.
    # Stand-in backbone projection (C -> 512 embedding).
    w_feat = jax.random.normal(k1, (C, EMB_DIM), dtype=jnp.float32) * 0.05
    b_feat = jax.random.normal(k2, (1, EMB_DIM), dtype=jnp.float32) * 0.05

    # torch.nn.Linear(512, 2) default init: U(-1/sqrt(512), 1/sqrt(512)).
    bound = 1.0 / (EMB_DIM ** 0.5)
    w_cls = jax.random.uniform(k3, (EMB_DIM, NUM_CLASSES), jnp.float32, -bound, bound)
    b_cls = jax.random.uniform(k4, (1, NUM_CLASSES), jnp.float32, -bound, bound)

    out = felix_classifier(x, w_feat, b_feat, w_cls, b_cls)
    jax.block_until_ready(out)
    assert out.shape == (N, NUM_CLASSES) and out.dtype == jnp.float32

    # Pure-JAX f32 reference for the same stand-in graph (kernel uses bf16 MXU
    # operands with f32 accumulation -> tolerance loosened accordingly).
    pooled_ref = x.reshape(N, C, H * W).mean(-1)
    feat_ref = pooled_ref @ w_feat + b_feat
    emb_ref = feat_ref / jnp.sqrt(jnp.sum(feat_ref * feat_ref, -1, keepdims=True) + 1e-12)
    ref = emb_ref @ w_cls + b_cls
    assert jnp.allclose(out, ref, atol=2e-2, rtol=2e-2), (out, ref)

    print("KERNEL_OK")
</pallas_src>

<mosaic_0001>
module attributes {stable_mosaic.version = 11 : i64} {
  func.func @felix_kernel(%arg0: i32, %arg1: memref<2x1024xf32, #tpu.memory_space<vmem>>, %arg2: memref<1024x512xbf16, #tpu.memory_space<vmem>>, %arg3: memref<1x512xf32, #tpu.memory_space<vmem>>, %arg4: memref<512x128xbf16, #tpu.memory_space<vmem>>, %arg5: memref<1x128xf32, #tpu.memory_space<vmem>>, %arg6: memref<2x128xf32, #tpu.memory_space<vmem>>) attributes {dimension_semantics = [#tpu.dimension_semantics<parallel>], iteration_bounds = array<i64: 1>, scalar_prefetch = 0 : i64, scratch_operands = 0 : i64, tpu.core_type = #tpu.core_type<tc>, window_params = [{transform_indices = @transform_0, window_bounds = array<i64: 2, 1024>}, {pipeline_mode = #tpu.pipeline_mode<synchronous>, transform_indices = @transform_1, window_bounds = array<i64: 1024, 512>}, {pipeline_mode = #tpu.pipeline_mode<synchronous>, transform_indices = @transform_2, window_bounds = array<i64: 1, 512>}, {pipeline_mode = #tpu.pipeline_mode<synchronous>, transform_indices = @transform_3, window_bounds = array<i64: 512, 128>}, {pipeline_mode = #tpu.pipeline_mode<synchronous>, transform_indices = @transform_4, window_bounds = array<i64: 1, 128>}, {transform_indices = @transform_5, window_bounds = array<i64: 2, 128>}]} {
    %c0 = arith.constant 0 : index
    %c0_0 = arith.constant 0 : index
    %0 = vector.load %arg1[%c0, %c0_0] : memref<2x1024xf32, #tpu.memory_space<vmem>>, vector<2x1024xf32>
    %1 = arith.truncf %0 : vector<2x1024xf32> to vector<2x1024xbf16>
    %c0_1 = arith.constant 0 : index
    %c0_2 = arith.constant 0 : index
    %2 = vector.load %arg2[%c0_1, %c0_2] : memref<1024x512xbf16, #tpu.memory_space<vmem>>, vector<1024x512xbf16>
    %cst = arith.constant dense<0.000000e+00> : vector<2x512xf32>
    %3 = tpu.matmul %1, %2, %cst {dimension_numbers = #tpu.dot_dimension_numbers<[1], [0], [0], [1], [0, 0, 1, 1], [], []>} : vector<2x1024xbf16>, vector<1024x512xbf16>, vector<2x512xf32> -> vector<2x512xf32>
    %c0_3 = arith.constant 0 : index
    %c0_4 = arith.constant 0 : index
    %4 = vector.load %arg3[%c0_3, %c0_4] : memref<1x512xf32, #tpu.memory_space<vmem>>, vector<1x512xf32>
    %5 = vector.broadcast %4 : vector<1x512xf32> to vector<2x512xf32>
    %6 = arith.addf %3, %5 : vector<2x512xf32>
    %7 = arith.mulf %6, %6 : vector<2x512xf32>
    %cst_5 = arith.constant dense<0.000000e+00> : vector<2xf32>
    %8 = vector.multi_reduction <add>, %7, %cst_5 [1] : vector<2x512xf32> to vector<2xf32>
    %9 = vector.shape_cast %8 : vector<2xf32> to vector<2x1xf32>
    %cst_6 = arith.constant 9.99999996E-13 : f32
    %10 = vector.broadcast %cst_6 : f32 to vector<2x1xf32>
    %11 = arith.addf %9, %10 : vector<2x1xf32>
    %12 = math.rsqrt %11 : vector<2x1xf32>
    %13 = arith.truncf %6 : vector<2x512xf32> to vector<2x512xbf16>
    %c0_7 = arith.constant 0 : index
    %c0_8 = arith.constant 0 : index
    %14 = vector.load %arg4[%c0_7, %c0_8] : memref<512x128xbf16, #tpu.memory_space<vmem>>, vector<512x128xbf16>
    %cst_9 = arith.constant dense<0.000000e+00> : vector<2x128xf32>
    %15 = tpu.matmul %13, %14, %cst_9 {dimension_numbers = #tpu.dot_dimension_numbers<[1], [0], [0], [1], [0, 0, 1, 1], [], []>} : vector<2x512xbf16>, vector<512x128xbf16>, vector<2x128xf32> -> vector<2x128xf32>
    %16 = vector.broadcast %12 : vector<2x1xf32> to vector<2x128xf32>
    %17 = arith.mulf %16, %15 : vector<2x128xf32>
    %c0_10 = arith.constant 0 : index
    %c0_11 = arith.constant 0 : index
    %18 = vector.load %arg5[%c0_10, %c0_11] : memref<1x128xf32, #tpu.memory_space<vmem>>, vector<1x128xf32>
    %19 = vector.broadcast %18 : vector<1x128xf32> to vector<2x128xf32>
    %20 = arith.addf %17, %19 : vector<2x128xf32>
    %c0_12 = arith.constant 0 : index
    %c0_13 = arith.constant 0 : index
    %21 = vector.load %arg6[%c0_12, %c0_13] : memref<2x128xf32, #tpu.memory_space<vmem>>, vector<2x128xf32>
    tpu.vector_store %arg6[%c0_12, %c0_13], %20 {strides = array<i32>} : memref<2x128xf32, #tpu.memory_space<vmem>>, vector<2x128xf32>,
    return
  }
  func.func @transform_0(%arg0: i32) -> (i32, i32) {
    %c0_i32 = arith.constant 0 : i32
    %c0_i32_0 = arith.constant 0 : i32
    return %arg0, %c0_i32 : i32, i32
  }
  func.func @transform_1(%arg0: i32) -> (i32, i32) {
    %c0_i32 = arith.constant 0 : i32
    %c0_i32_0 = arith.constant 0 : i32
    %c0_i32_1 = arith.constant 0 : i32
    return %c0_i32, %c0_i32_0 : i32, i32
  }
  func.func @transform_2(%arg0: i32) -> (i32, i32) {
    %c0_i32 = arith.constant 0 : i32
    %c0_i32_0 = arith.constant 0 : i32
    %c0_i32_1 = arith.constant 0 : i32
    return %c0_i32, %c0_i32_0 : i32, i32
  }
  func.func @transform_3(%arg0: i32) -> (i32, i32) {
    %c0_i32 = arith.constant 0 : i32
    %c0_i32_0 = arith.constant 0 : i32
    %c0_i32_1 = arith.constant 0 : i32
    return %c0_i32, %c0_i32_0 : i32, i32
  }
  func.func @transform_4(%arg0: i32) -> (i32, i32) {
    %c0_i32 = arith.constant 0 : i32
    %c0_i32_0 = arith.constant 0 : i32
    %c0_i32_1 = arith.constant 0 : i32
    return %c0_i32, %c0_i32_0 : i32, i32
  }
  func.func @transform_5(%arg0: i32) -> (i32, i32) {
    %c0_i32 = arith.constant 0 : i32
    %c0_i32_0 = arith.constant 0 : i32
    return %arg0, %c0_i32 : i32, i32
  }
}

</mosaic_0001>

<bundles_post_ra>
// kernel: tpu_custom_call.1
= control target key start
LH: loop header
LB: loop body
LE: loop exit
PB: predicated region body
PF: predicated region fallthrough
CT: control target
= control target key end

     0   :  { %10 = vsyncpa [#allocation3], 0  ;;  %s3400_s0 = inlined_call_operand.hbm [shape: f32[2,1024], index: 0, kind: input, shape index: {}]   ;;  %s3401_s1 = inlined_call_operand.hbm [shape: bf16[1024,512], index: 1, kind: input, shape index: {}]   ;;  %s3402_s2 = inlined_call_operand.vmem [shape: f32[1,512], index: 2, kind: input, shape index: {}]   ;;  %s3403_s3 = inlined_call_operand.hbm [shape: bf16[512,128], index: 3, kind: input, shape index: {}]   ;;  %s3404_s4 = inlined_call_operand.vmem [shape: f32[1,128], index: 4, kind: input, shape index: {}]   ;;  %s3405_s5 = inlined_call_operand.hbm [shape: f32[2,128], index: 5, kind: output, shape index: {}]  }
   0x1   :  { %11 = vsyncpa [#allocation6], 0 }
   0x2   :  { %12 = vsyncpa [#allocation4], 0  ;;  %s3267_s18 = smov [#allocation5]   ;;  %s3173_s22 = scalar_lea.hbm %s3401_s1, 32768 }
   0x3   :  { %s28_s19 = sshll.u32 %s3267_s18, 4  ;;  %p3174_p0 = scmp.ne.s32.totalorder %s3401_s1, %s3173_s22  ;;  %s29_s19 = int_to_ptr.vmem [resolvable:$true] %s28_s19 }
   0x4   :  { %p3177_p1 = scmp.lt.u32.totalorder %s3173_s22, %s3401_s1 }
   0x6   :  { %p3179_p2 = pnand %p3177_p1, %p3174_p0 }
   0x8   :  { %3182 = shalt.err (!%p3179_p2)
}
   0x9   :  { %s3183_s27 = scalar_lea.vmem %s29_s19, 32768  ;;  %p3188_p4 = scmp.lt.s32.totalorder %s29_s19, %s29_s19 }
   0xa   :  { %p3184_p3 = scmp.ne.s32.totalorder %s29_s19, %s3183_s27  ;;  %p3189_p5 = scmp.lt.s32.totalorder %s3183_s27, %s3183_s27 }
   0xc   :  { %p3190_p6 = por %p3189_p5, %p3188_p4 }
   0xe   :  { %p3191_p7 = pnand %p3190_p6, %p3184_p3 }
  0x10   :  { %3194 = shalt.err (!%p3191_p7)
}
  0x11   :  { %s3268_s28 = smov 256   ;;  %s3269_s29 = smov 16  }
  0x12   :  { %34 = dma.hbm_to_vmem [thread:$0]  %s3401_s1, 32768, %s29_s19, [#allocation6], %s3268_s28, %s3268_s28, %s3269_s29  }
  0x13   :  { %s3270_s7 = smov [#allocation2]   ;;  %s3271_s9 = smov [#allocation7]  }
  0x14   :  { %s19_s8 = sshll.u32 %s3270_s7, 4  ;;  %s42_s10 = sshll.u32 %s3271_s9, 4  ;;  %s20_s8 = int_to_ptr.vmem [resolvable:$true] %s19_s8  ;;  %s43_s10 = int_to_ptr.vmem [resolvable:$true] %s42_s10 }
  0x15   :  { %s3195_s13 = scalar_lea.hbm %s3400_s0, 256 }
  0x16   :  { %p3196_p8 = scmp.ne.s32.totalorder %s3400_s0, %s3195_s13  ;;  %p3199_p9 = scmp.lt.u32.totalorder %s3195_s13, %s3400_s0 }
  0x18   :  { %p3201_p10 = pnand %p3199_p9, %p3196_p8 }
  0x1a   :  { %3204 = shalt.err (!%p3201_p10)
}
  0x1b   :  { %s3205_s1 = scalar_lea.vmem %s20_s8, 256  ;;  %p3210_p12 = scmp.lt.s32.totalorder %s20_s8, %s20_s8 }
  0x1c   :  { %p3206_p11 = scmp.ne.s32.totalorder %s20_s8, %s3205_s1  ;;  %p3211_p13 = scmp.lt.s32.totalorder %s3205_s1, %s3205_s1 }
  0x1e   :  { %p3212_p0 = por %p3211_p13, %p3210_p12 }
  0x20   :  { %p3213_p1 = pnand %p3212_p0, %p3206_p11 }
  0x22   :  { %3216 = shalt.err (!%p3213_p1)
}
  0x23   :  { %22 = dma.hbm_to_vmem [thread:$0]  %s3400_s0, 256, %s20_s8, [#allocation3]  }
  0x24   :  { %s3217_s22 = scalar_lea.hbm %s3403_s3, 4096 }
  0x25   :  { %p3218_p2 = scmp.ne.s32.totalorder %s3403_s3, %s3217_s22  ;;  %p3221_p3 = scmp.lt.u32.totalorder %s3217_s22, %s3403_s3 }
  0x27   :  { %p3223_p4 = pnand %p3221_p3, %p3218_p2 }
  0x29   :  { %3226 = shalt.err (!%p3223_p4)
}
  0x2a   :  { %s3227_s27 = scalar_lea.vmem %s43_s10, 4096  ;;  %p3232_p6 = scmp.lt.s32.totalorder %s43_s10, %s43_s10 }
  0x2b   :  { %p3228_p5 = scmp.ne.s32.totalorder %s43_s10, %s3227_s27  ;;  %p3233_p7 = scmp.lt.s32.totalorder %s3227_s27, %s3227_s27 }
  0x2d   :  { %p3234_p8 = por %p3233_p7, %p3232_p6 }
  0x2f   :  { %p3235_p9 = pnand %p3234_p8, %p3228_p5 }
  0x31   :  { %3238 = shalt.err (!%p3235_p9)
}
  0x32   :  { %s3272_s0 = smov 64   ;;  %s3273_s28 = smov 4  }
  0x33   :  { %48 = dma.hbm_to_vmem [thread:$0]  %s3403_s3, 4096, %s43_s10, [#allocation6], %s3272_s0, %s3272_s0, %s3273_s28  }
  0x34   :  { %3261 = dma.done.wait [#allocation3], 256  }
  0x35   :  { %3262 = vsyncadd [#allocation3], 4294967040 }
  0x36   :  { %3263 = dma.done.wait [#allocation6], 36864  }
  0x37   :  { %3264 = vsyncadd [#allocation6], 4294930432  ;;  %v2753_v0 = vld [vmem:[#allocation5 + $0x4] ss:$16 sps:$4 sm:$0xff]   ;;  %v2755_v1 = vld [vmem:[#allocation5 + $0xc] ss:$16 sps:$4 sm:$0xff]   ;;  %v69_v38 = vlaneseq }
  0x38   :  { %1673 = vmatprep.subr.bf16.mxu0 %v2753_v0  ;;  %v2757_v2 = vld [vmem:[#allocation5] ss:$16 sps:$4 sm:$0xff]   ;;  %v2758_v3 = vld [vmem:[#allocation5 + $0x8] ss:$16 sps:$4 sm:$0xff]   ;;  %1837 = vmatprep.subr.bf16.mxu1 %v2755_v1  ;;  %v2759_v4 = vld [vmem:[#allocation5 + $0x24] ss:$16 sps:$4 sm:$0xff]  }
  0x39   :  { %1674 = vmatpush1.bf16.msra.mxu0 %v2757_v2  ;;  %1838 = vmatpush1.bf16.msra.mxu1 %v2758_v3  ;;  %v2761_v5 = vld [vmem:[#allocation5 + $0x2c] ss:$16 sps:$4 sm:$0xff]   ;;  %v2763_v6 = vld [vmem:[#allocation5 + $0x20] ss:$16 sps:$4 sm:$0xff]   ;;  %v2764_v7 = vld [vmem:[#allocation5 + $0x28] ss:$16 sps:$4 sm:$0xff]  }
  0x3a   :  { %1675 = vmatprep.subr.bf16.mxu0 %v2759_v4  ;;  %1839 = vmatprep.subr.bf16.mxu1 %v2761_v5  ;;  %v2765_v8 = vld [vmem:[#allocation5 + $0x44] ss:$16 sps:$4 sm:$0xff]   ;;  %v2767_v9 = vld [vmem:[#allocation5 + $0x4c] ss:$16 sps:$4 sm:$0xff]   ;;  %v2769_v10 = vld [vmem:[#allocation5 + $0x40] ss:$16 sps:$4 sm:$0xff]  }
  0x3b   :  { %v2770_v11 = vld [vmem:[#allocation5 + $0x48] ss:$16 sps:$4 sm:$0xff]   ;;  %v2771_v12 = vld [vmem:[#allocation5 + $0x64] ss:$16 sps:$4 sm:$0xff]   ;;  %v2773_v13 = vld [vmem:[#allocation5 + $0x6c] ss:$16 sps:$4 sm:$0xff]  }
  0x3c   :  { %v2775_v14 = vld [vmem:[#allocation5 + $0x60] ss:$16 sps:$4 sm:$0xff]   ;;  %v2776_v15 = vld [vmem:[#allocation5 + $0x68] ss:$16 sps:$4 sm:$0xff]   ;;  %v2777_v16 = vld [vmem:[#allocation5 + $0x84] ss:$16 sps:$4 sm:$0xff]  }
  0x3d   :  { %1676 = vmatpush1.bf16.msra.mxu0 %v2763_v6  ;;  %1840 = vmatpush1.bf16.msra.mxu1 %v2764_v7  ;;  %v2779_v17 = vld [vmem:[#allocation5 + $0x8c] ss:$16 sps:$4 sm:$0xff]   ;;  %v2781_v18 = vld [vmem:[#allocation5 + $0x80] ss:$16 sps:$4 sm:$0xff]   ;;  %v2782_v19 = vld [vmem:[#allocation5 + $0x88] ss:$16 sps:$4 sm:$0xff]  }
  0x3e   :  { %1677 = vmatprep.subr.bf16.mxu0 %v2765_v8  ;;  %1841 = vmatprep.subr.bf16.mxu1 %v2767_v9  ;;  %v2783_v20 = vld [vmem:[#allocation5 + $0xa4] ss:$16 sps:$4 sm:$0xff]   ;;  %v2785_v21 = vld [vmem:[#allocation5 + $0xac] ss:$16 sps:$4 sm:$0xff]   ;;  %v2787_v22 = vld [vmem:[#allocation5 + $0xa0] ss:$16 sps:$4 sm:$0xff]  }
  0x3f   :  { %v2788_v23 = vld [vmem:[#allocation5 + $0xa8] ss:$16 sps:$4 sm:$0xff]   ;;  %v2789_v24 = vld [vmem:[#allocation5 + $0xc4] ss:$16 sps:$4 sm:$0xff]   ;;  %v2791_v25 = vld [vmem:[#allocation5 + $0xcc] ss:$16 sps:$4 sm:$0xff]  }
  0x40   :  { %v2793_v26 = vld [vmem:[#allocation5 + $0xc0] ss:$16 sps:$4 sm:$0xff]   ;;  %v2794_v27 = vld [vmem:[#allocation5 + $0xc8] ss:$16 sps:$4 sm:$0xff]   ;;  %v2795_v28 = vld [vmem:[#allocation5 + $0xe4] ss:$16 sps:$4 sm:$0xff]  }
  0x41   :  { %1678 = vmatpush1.bf16.msra.mxu0 %v2769_v10  ;;  %1842 = vmatpush1.bf16.msra.mxu1 %v2770_v11  ;;  %v2797_v29 = vld [vmem:[#allocation5 + $0xec] ss:$16 sps:$4 sm:$0xff]   ;;  %v2799_v30 = vld [vmem:[#allocation5 + $0xe0] ss:$16 sps:$4 sm:$0xff]   ;;  %v2800_v31 = vld [vmem:[#allocation5 + $0xe8] ss:$16 sps:$4 sm:$0xff]  }
  0x42   :  { %1679 = vmatprep.subr.bf16.mxu0 %v2771_v12  ;;  %1843 = vmatprep.subr.bf16.mxu1 %v2773_v13  ;;  %v2801_v32 = vld [vmem:[#allocation5 + $0x104] ss:$16 sps:$4 sm:$0xff]   ;;  %v2803_v33 = vld [vmem:[#allocation5 + $0x10c] ss:$16 sps:$4 sm:$0xff]   ;;  %v2805_v34 = vld [vmem:[#allocation5 + $0x100] ss:$16 sps:$4 sm:$0xff]  }
  0x43   :  { %v2806_v35 = vld [vmem:[#allocation5 + $0x108] ss:$16 sps:$4 sm:$0xff]   ;;  %v3274_v36 = vmov 1983009808   ;;  %v2807_v39 = vld [vmem:[#allocation5 + $0x124] ss:$16 sps:$4 sm:$0xff]  }
  0x44   :  { %v67_v37 = vunpack.c.l.s4 %v3274_v36  ;;  %v2809_v40 = vld [vmem:[#allocation5 + $0x12c] ss:$16 sps:$4 sm:$0xff]   ;;  %v2811_v41 = vld [vmem:[#allocation5 + $0x120] ss:$16 sps:$4 sm:$0xff]   ;;  %v3342_v43 = vshrl.u32 %v69_v38, 7  ;;  %vm2005_vm0 = vcmask 1041408  }
  0x45   :  { %1680 = vmatpush1.bf16.msra.mxu0 %v2775_v14  ;;  %1844 = vmatpush1.bf16.msra.mxu1 %v2776_v15  ;;  %v2812_v44 = vld [vmem:[#allocation5 + $0x128] ss:$16 sps:$4 sm:$0xff]   ;;  %v2813_v45 = vld [vmem:[#allocation5 + $0x144] ss:$16 sps:$4 sm:$0xff]   ;;  %v2815_v46 = vld [vmem:[#allocation5 + $0x14c] ss:$16 sps:$4 sm:$0xff]  }
  0x46   :  { %1681 = vmatprep.subr.bf16.mxu0 %v2777_v16  ;;  %1845 = vmatprep.subr.bf16.mxu1 %v2779_v17  ;;  %v68_v42 = vunpack.c.0.s8 %v67_v37  ;;  %v2817_v47 = vld [vmem:[#allocation5 + $0x140] ss:$16 sps:$4 sm:$0xff]   ;;  %v2818_v48 = vld [vmem:[#allocation5 + $0x148] ss:$16 sps:$4 sm:$0xff]   ;;  %v2819_v50 = vld [vmem:[#allocation5 + $0x164] ss:$16 sps:$4 sm:$0xff]  }
  0x47   :  { %v2821_v51 = vld [vmem:[#allocation5 + $0x16c] ss:$16 sps:$4 sm:$0xff]   ;;  %v61_v52 = vld [vmem:[#allocation2] sm:$0xff]  ;;  %v2824_v55 = vld [vmem:[#allocation5 + $0x168] ss:$16 sps:$4 sm:$0xff]   ;;  %s3275_s8 = smov [#allocation8]  }
  0x48   :  { %v3345_v49 = vsub.s32 %v68_v42, %v3342_v43  ;;  %v2823_v53 = vld [vmem:[#allocation5 + $0x160] ss:$16 sps:$4 sm:$0xff]   ;;  %v2825_v56 = vld [vmem:[#allocation5 + $0x184] ss:$16 sps:$4 sm:$0xff]   ;;  %v2827_v57 = vld [vmem:[#allocation5 + $0x18c] ss:$16 sps:$4 sm:$0xff]   ;;  %v65_v4 = vcombine.high %v61_v52, %v61_v52 }
  0x49   :  { %1682 = vmatpush1.bf16.msra.mxu0 %v2781_v18  ;;  %1846 = vmatpush1.bf16.msra.mxu1 %v2782_v19  ;;  %v2829_v59 = vld [vmem:[#allocation5 + $0x180] ss:$16 sps:$4 sm:$0xff]   ;;  %v2830_v61 = vld [vmem:[#allocation5 + $0x188] ss:$16 sps:$4 sm:$0xff]   ;;  %v2831_v62 = vld [vmem:[#allocation5 + $0x1a4] ss:$16 sps:$4 sm:$0xff]  }
  0x4a   :  { %1683 = vmatprep.subr.bf16.mxu0 %v2783_v20  ;;  %1847 = vmatprep.subr.bf16.mxu1 %v2785_v21  ;;  %v72_v54 = vrot.slane %v61_v52, %v3345_v49  ;;  %v2833_v63 = vld [vmem:[#allocation5 + $0x1ac] ss:$16 sps:$4 sm:$0xff]   ;;  %v2835_v0 = vld [vmem:[#allocation5 + $0x1a0] ss:$16 sps:$4 sm:$0xff]   ;;  %v2836_v1 = vld [vmem:[#allocation5 + $0x1a8] ss:$16 sps:$4 sm:$0xff]   ;;  %v3349_v9 = vrot.slane %v65_v4, %v3345_v49 }
  0x4b   :  { %v2837_v2 = vld [vmem:[#allocation5 + $0x1c4] ss:$16 sps:$4 sm:$0xff]   ;;  %v2839_v3 = vld [vmem:[#allocation5 + $0x1cc] ss:$16 sps:$4 sm:$0xff]   ;;  %v2841_v5 = vld [vmem:[#allocation5 + $0x1c0] ss:$16 sps:$4 sm:$0xff]  }
  0x4c   :  { %v80_v58 = vcombine.high %v72_v54, %v72_v54  ;;  %v2842_v6 = vld [vmem:[#allocation5 + $0x1c8] ss:$16 sps:$4 sm:$0xff]   ;;  %v2843_v7 = vld [vmem:[#allocation5 + $0x1e4] ss:$16 sps:$4 sm:$0xff]   ;;  %v2845_v8 = vld [vmem:[#allocation5 + $0x1ec] ss:$16 sps:$4 sm:$0xff]   ;;  %v81_v14 = vcombine.high %v3349_v9, %v3349_v9  ;;  %v107_v16 = vpack.c.bf16 %v72_v54, %v72_v54 }
  0x4d   :  { %1684 = vmatpush1.bf16.msra.mxu0 %v2787_v22  ;;  %1848 = vmatpush1.bf16.msra.mxu1 %v2788_v23  ;;  %v2847_v10 = vld [vmem:[#allocation5 + $0x1e0] ss:$16 sps:$4 sm:$0xff]   ;;  %v2848_v11 = vld [vmem:[#allocation5 + $0x1e8] ss:$16 sps:$4 sm:$0xff]   ;;  %v2852_v12 = vld [vmem:[#allocation5 + $0x204] ss:$16 sps:$4 sm:$0xff]  }
  0x4e   :  { %1685 = vmatprep.subr.bf16.mxu0 %v2789_v24  ;;  %1849 = vmatprep.subr.bf16.mxu1 %v2791_v25  ;;  %v108_v60 = vpack.c.bf16 %v80_v58, %v80_v58  ;;  %v2855_v13 = vld [vmem:[#allocation5 + $0x20c] ss:$16 sps:$4 sm:$0xff]   ;;  %v2850_v15 = vld [vmem:[#allocation5 + $0x200] ss:$16 sps:$4 sm:$0xff]   ;;  %v2853_v17 = vld [vmem:[#allocation5 + $0x208] ss:$16 sps:$4 sm:$0xff]   ;;  %v110_v20 = vpack.c.bf16 %v81_v14, %v81_v14 }
  0x4f   :  { %v2858_v18 = vld [vmem:[#allocation5 + $0x224] ss:$16 sps:$4 sm:$0xff]   ;;  %v2861_v19 = vld [vmem:[#allocation5 + $0x22c] ss:$16 sps:$4 sm:$0xff]   ;;  %v2856_v21 = vld [vmem:[#allocation5 + $0x220] ss:$16 sps:$4 sm:$0xff]  }
  0x50   :  { %1705 = vmatprep.mubr.bf16.mxu0 %v108_v60  ;;  %1869 = vmatprep.mubr.bf16.mxu1 %v108_v60  ;;  %v2859_v22 = vld [vmem:[#allocation5 + $0x228] ss:$16 sps:$4 sm:$0xff]   ;;  %v2864_v23 = vld [vmem:[#allocation5 + $0x244] ss:$16 sps:$4 sm:$0xff]   ;;  %v2867_v24 = vld [vmem:[#allocation5 + $0x24c] ss:$16 sps:$4 sm:$0xff]  }
  0x51   :  { %1686 = vmatpush1.bf16.msra.mxu0 %v2793_v26  ;;  %1850 = vmatpush1.bf16.msra.mxu1 %v2794_v27  ;;  %v2862_v25 = vld [vmem:[#allocation5 + $0x240] ss:$16 sps:$4 sm:$0xff]   ;;  %v2865_v26 = vld [vmem:[#allocation5 + $0x248] ss:$16 sps:$4 sm:$0xff]   ;;  %v2870_v27 = vld [vmem:[#allocation5 + $0x264] ss:$16 sps:$4 sm:$0xff]  }
  0x52   :  { %1687 = vmatprep.subr.bf16.mxu0 %v2795_v28  ;;  %1851 = vmatprep.subr.bf16.mxu1 %v2797_v29  ;;  %v2873_v28 = vld [vmem:[#allocation5 + $0x26c] ss:$16 sps:$4 sm:$0xff]   ;;  %v2868_v29 = vld [vmem:[#allocation5 + $0x260] ss:$16 sps:$4 sm:$0xff]   ;;  %v2883_v38 = vld [vmem:[#allocation5 + $0x2a8] ss:$16 sps:$4 sm:$0xff]  }
  0x53   :  { %v2885_v36 = vld [vmem:[#allocation5 + $0x2ac] ss:$16 sps:$4 sm:$0xff]   ;;  %v2880_v37 = vld [vmem:[#allocation5 + $0x2a0] ss:$16 sps:$4 sm:$0xff]   ;;  %v2889_v42 = vld [vmem:[#allocation5 + $0x2c8] ss:$16 sps:$4 sm:$0xff]  }
  0x54   :  { %v2901_v52 = vld [vmem:[#allocation5 + $0x308] ss:$16 sps:$4 sm:$0xff]   ;;  %v2909_v54 = vld [vmem:[#allocation5 + $0x32c] ss:$16 sps:$4 sm:$0xff]   ;;  %v2942_v14 = vld [vmem:[#allocation5 + $0x3e4] ss:$16 sps:$4 sm:$0xff]  }
  0x55   :  { %1688 = vmatpush1.bf16.msra.mxu0 %v2799_v30  ;;  %1852 = vmatpush1.bf16.msra.mxu1 %v2800_v31  ;;  %v2871_v30 = vld [vmem:[#allocation5 + $0x268] ss:$16 sps:$4 sm:$0xff]   ;;  %v2876_v31 = vld [vmem:[#allocation5 + $0x284] ss:$16 sps:$4 sm:$0xff]   ;;  %v2915_v58 = vld [vmem:[#allocation5 + $0x34c] ss:$16 sps:$4 sm:$0xff]  }
  0x56   :  { %1689 = vmatprep.subr.bf16.mxu0 %v2801_v32  ;;  %1853 = vmatprep.subr.bf16.mxu1 %v2803_v33  ;;  %v2879_v32 = vld [vmem:[#allocation5 + $0x28c] ss:$16 sps:$4 sm:$0xff]   ;;  %v2874_v33 = vld [vmem:[#allocation5 + $0x280] ss:$16 sps:$4 sm:$0xff]   ;;  %v2913_v60 = vld [vmem:[#allocation5 + $0x348] ss:$16 sps:$4 sm:$0xff]  }
  0x57   :  { %v2925_v4 = vld [vmem:[#allocation5 + $0x388] ss:$16 sps:$4 sm:$0xff]   ;;  %s2373_s9 = sshll.u32 %s3275_s8, 4  ;;  %s2374_s9 = int_to_ptr.vmem [resolvable:$true] %s2373_s9 }
  0x58   :  { %s3239_s10 = scalar_lea.vmem %s2374_s9, 32  ;;  %p3244_p11 = scmp.lt.s32.totalorder %s2374_s9, %s2374_s9 }
  0x59   :  { %1690 = vmatpush1.bf16.msra.mxu0 %v2805_v34  ;;  %1854 = vmatpush1.bf16.msra.mxu1 %v2806_v35  ;;  %v2877_v34 = vld [vmem:[#allocation5 + $0x288] ss:$16 sps:$4 sm:$0xff]   ;;  %v2882_v35 = vld [vmem:[#allocation5 + $0x2a4] ss:$16 sps:$4 sm:$0xff]   ;;  %p3240_p10 = scmp.ne.s32.totalorder %s2374_s9, %s3239_s10  ;;  %p3245_p12 = scmp.lt.s32.totalorder %s3239_s10, %s3239_s10 }
  0x5a   :  { %1691 = vmatprep.subr.bf16.mxu0 %v2807_v39  ;;  %1855 = vmatprep.subr.bf16.mxu1 %v2809_v40  ;;  %v2888_v39 = vld [vmem:[#allocation5 + $0x2c4] ss:$16 sps:$4 sm:$0xff]   ;;  %v2891_v40 = vld [vmem:[#allocation5 + $0x2cc] ss:$16 sps:$4 sm:$0xff]  }
  0x5b   :  { %p3246_p13 = por %p3245_p12, %p3244_p11 }
  0x5d   :  { %1692 = vmatpush1.bf16.msra.mxu0 %v2811_v41  ;;  %1856 = vmatpush1.bf16.msra.mxu1 %v2812_v44  ;;  %v2886_v41 = vld [vmem:[#allocation5 + $0x2c0] ss:$16 sps:$4 sm:$0xff]   ;;  %v2894_v44 = vld [vmem:[#allocation5 + $0x2e4] ss:$16 sps:$4 sm:$0xff]   ;;  %p3247_p0 = pnand %p3246_p13, %p3240_p10 }
  0x5e   :  { %1693 = vmatprep.subr.bf16.mxu0 %v2813_v45  ;;  %1857 = vmatprep.subr.bf16.mxu1 %v2815_v46  ;;  %v2897_v45 = vld [vmem:[#allocation5 + $0x2ec] ss:$16 sps:$4 sm:$0xff]   ;;  %v2892_v46 = vld [vmem:[#allocation5 + $0x2e0] ss:$16 sps:$4 sm:$0xff]  }
  0x61   :  { %1694 = vmatpush1.bf16.msra.mxu0 %v2817_v47  ;;  %1858 = vmatpush1.bf16.msra.mxu1 %v2818_v48  ;;  %v2895_v47 = vld [vmem:[#allocation5 + $0x2e8] ss:$16 sps:$4 sm:$0xff]   ;;  %v2900_v48 = vld [vmem:[#allocation5 + $0x304] ss:$16 sps:$4 sm:$0xff]  }
  0x62   :  { %1695 = vmatprep.subr.bf16.mxu0 %v2819_v50  ;;  %1859 = vmatprep.subr.bf16.mxu1 %v2821_v51  ;;  %v2903_v50 = vld [vmem:[#allocation5 + $0x30c] ss:$16 sps:$4 sm:$0xff]   ;;  %v2898_v51 = vld [vmem:[#allocation5 + $0x300] ss:$16 sps:$4 sm:$0xff]  }
  0x65   :  { %1696 = vmatpush1.bf16.msra.mxu0 %v2823_v53  ;;  %1860 = vmatpush1.bf16.msra.mxu1 %v2824_v55  ;;  %v2906_v53 = vld [vmem:[#allocation5 + $0x324] ss:$16 sps:$4 sm:$0xff]   ;;  %v2904_v55 = vld [vmem:[#allocation5 + $0x320] ss:$16 sps:$4 sm:$0xff]  }
  0x66   :  { %1697 = vmatprep.subr.bf16.mxu0 %v2825_v56  ;;  %1861 = vmatprep.subr.bf16.mxu1 %v2827_v57  ;;  %v2907_v56 = vld [vmem:[#allocation5 + $0x328] ss:$16 sps:$4 sm:$0xff]   ;;  %v2912_v57 = vld [vmem:[#allocation5 + $0x344] ss:$16 sps:$4 sm:$0xff]  }
  0x69   :  { %1698 = vmatpush1.bf16.msra.mxu0 %v2829_v59  ;;  %1862 = vmatpush1.bf16.msra.mxu1 %v2830_v61  ;;  %v2910_v59 = vld [vmem:[#allocation5 + $0x340] ss:$16 sps:$4 sm:$0xff]   ;;  %v2918_v61 = vld [vmem:[#allocation5 + $0x364] ss:$16 sps:$4 sm:$0xff]  }
  0x6a   :  { %1699 = vmatprep.subr.bf16.mxu0 %v2831_v62  ;;  %1863 = vmatprep.subr.bf16.mxu1 %v2833_v63  ;;  %v2921_v62 = vld [vmem:[#allocation5 + $0x36c] ss:$16 sps:$4 sm:$0xff]   ;;  %v2916_v63 = vld [vmem:[#allocation5 + $0x360] ss:$16 sps:$4 sm:$0xff]  }
  0x6d   :  { %1700 = vmatpush1.bf16.msra.mxu0 %v2835_v0  ;;  %1864 = vmatpush1.bf16.msra.mxu1 %v2836_v1  ;;  %v2919_v0 = vld [vmem:[#allocation5 + $0x368] ss:$16 sps:$4 sm:$0xff]   ;;  %v2924_v1 = vld [vmem:[#allocation5 + $0x384] ss:$16 sps:$4 sm:$0xff]  }
  0x6e   :  { %1701 = vmatprep.subr.bf16.mxu0 %v2837_v2  ;;  %1865 = vmatprep.subr.bf16.mxu1 %v2839_v3  ;;  %v2927_v2 = vld [vmem:[#allocation5 + $0x38c] ss:$16 sps:$4 sm:$0xff]   ;;  %v2922_v3 = vld [vmem:[#allocation5 + $0x380] ss:$16 sps:$4 sm:$0xff]  }
  0x71   :  { %1702 = vmatpush1.bf16.msra.mxu0 %v2841_v5  ;;  %1866 = vmatpush1.bf16.msra.mxu1 %v2842_v6  ;;  %v2930_v5 = vld [vmem:[#allocation5 + $0x3a4] ss:$16 sps:$4 sm:$0xff]   ;;  %v2933_v6 = vld [vmem:[#allocation5 + $0x3ac] ss:$16 sps:$4 sm:$0xff]  }
  0x72   :  { %1703 = vmatprep.subr.bf16.mxu0 %v2843_v7  ;;  %1867 = vmatprep.subr.bf16.mxu1 %v2845_v8  ;;  %v2928_v7 = vld [vmem:[#allocation5 + $0x3a0] ss:$16 sps:$4 sm:$0xff]   ;;  %v2931_v8 = vld [vmem:[#allocation5 + $0x3a8] ss:$16 sps:$4 sm:$0xff]  }
  0x75   :  { %1704 = vmatpush1.bf16.msra.mxu0 %v2847_v10  ;;  %1868 = vmatpush1.bf16.msra.mxu1 %v2848_v11  ;;  %v2936_v10 = vld [vmem:[#allocation5 + $0x3c4] ss:$16 sps:$4 sm:$0xff]   ;;  %v2939_v11 = vld [vmem:[#allocation5 + $0x3cc] ss:$16 sps:$4 sm:$0xff]  }
  0x76   :  { %1714 = vmatprep.subr.bf16.mxu0 %v2852_v12  ;;  %1878 = vmatprep.subr.bf16.mxu1 %v2855_v13  ;;  %v2934_v12 = vld [vmem:[#allocation5 + $0x3c0] ss:$16 sps:$4 sm:$0xff]   ;;  %v2937_v13 = vld [vmem:[#allocation5 + $0x3c8] ss:$16 sps:$4 sm:$0xff]  }
  0x78   :  { %1706 = vmatmul.mubr.bf16.vlgmr.msra.gmra.mrb[0].mxu0 %v107_v16  ;;  %1870 = vmatmul.mubr.bf16.vlgmr.msra.gmra.mrb[0].mxu1 %v107_v16  ;;  %v2940_v16 = vld [vmem:[#allocation5 + $0x3e0] ss:$16 sps:$4 sm:$0xff]  }
  0x79   :  { %1715 = vmatpush1.bf16.msra.mxu0 %v2850_v15  ;;  %1879 = vmatpush1.bf16.msra.mxu1 %v2853_v17  ;;  %v2945_v15 = vld [vmem:[#allocation5 + $0x3ec] ss:$16 sps:$4 sm:$0xff]   ;;  %v2943_v17 = vld [vmem:[#allocation5 + $0x3e8] ss:$16 sps:$4 sm:$0xff]  }
  0x7a   :  { %1716 = vmatprep.subr.bf16.mxu0 %v2858_v18  ;;  %1880 = vmatprep.subr.bf16.mxu1 %v2861_v19  ;;  %v2948_v18 = vld [vmem:[#allocation5 + $0x404] ss:$16 sps:$4 sm:$0xff]   ;;  %v2951_v19 = vld [vmem:[#allocation5 + $0x40c] ss:$16 sps:$4 sm:$0xff]  }
  0x7b   :  { %1746 = vmatprep.mubr.bf16.mxu0 %v110_v20  ;;  %1910 = vmatprep.mubr.bf16.mxu1 %v110_v20  ;;  %v2946_v20 = vld [vmem:[#allocation5 + $0x400] ss:$16 sps:$4 sm:$0xff]  }
  0x7d   :  { %1717 = vmatpush1.bf16.msra.mxu0 %v2856_v21  ;;  %1881 = vmatpush1.bf16.msra.mxu1 %v2859_v22  ;;  %v109_v21 = vpack.c.bf16 %v3349_v9, %v3349_v9  ;;  %v2949_v22 = vld [vmem:[#allocation5 + $0x408] ss:$16 sps:$4 sm:$0xff]   ;;  %v2952_v9 = vld [vmem:[#allocation5 + $0x420] ss:$16 sps:$4 sm:$0xff]  }
  0x7e   :  { %1718 = vmatprep.subr.bf16.mxu0 %v2864_v23  ;;  %1882 = vmatprep.subr.bf16.mxu1 %v2867_v24  ;;  %v3355_v23 = vld [vmem:[#allocation2 + $0x8] sm:$0xff]  ;;  %v2954_v24 = vld [vmem:[#allocation5 + $0x424] ss:$16 sps:$4 sm:$0xff]  }
  0x81   :  { %1719 = vmatpush1.bf16.msra.mxu0 %v2862_v25  ;;  %1883 = vmatpush1.bf16.msra.mxu1 %v2865_v26  ;;  %v2957_v25 = vld [vmem:[#allocation5 + $0x42c] ss:$16 sps:$4 sm:$0xff]   ;;  %v3359_v26 = vrot.slane %v3355_v23, %v3345_v49 }
  0x82   :  { %1720 = vmatprep.subr.bf16.mxu0 %v2870_v27  ;;  %1884 = vmatprep.subr.bf16.mxu1 %v2873_v28  ;;  %v2955_v28 = vld [vmem:[#allocation5 + $0x428] ss:$16 sps:$4 sm:$0xff]  }
  0x83   :  { %v97_v27 = vcombine.high %v3359_v26, %v3359_v26 }
  0x85   :  { %1721 = vmatpush1.bf16.msra.mxu0 %v2868_v29  ;;  %1885 = vmatpush1.bf16.msra.mxu1 %v2871_v30  ;;  %v2960_v29 = vld [vmem:[#allocation5 + $0x444] ss:$16 sps:$4 sm:$0xff]   ;;  %v2963_v30 = vld [vmem:[#allocation5 + $0x44c] ss:$16 sps:$4 sm:$0xff]  }
  0x86   :  { %1722 = vmatprep.subr.bf16.mxu0 %v2876_v31  ;;  %1886 = vmatprep.subr.bf16.mxu1 %v2879_v32  ;;  %v112_v31 = vpack.c.bf16 %v97_v27, %v97_v27  ;;  %v2958_v32 = vld [vmem:[#allocation5 + $0x440] ss:$16 sps:$4 sm:$0xff]  }
  0x89   :  { %1723 = vmatpush1.bf16.msra.mxu0 %v2874_v33  ;;  %1887 = vmatpush1.bf16.msra.mxu1 %v2877_v34  ;;  %v2961_v33 = vld [vmem:[#allocation5 + $0x448] ss:$16 sps:$4 sm:$0xff]   ;;  %v2966_v34 = vld [vmem:[#allocation5 + $0x464] ss:$16 sps:$4 sm:$0xff]  }
  0x8a   :  { %1724 = vmatprep.subr.bf16.mxu0 %v2882_v35  ;;  %1888 = vmatprep.subr.bf16.mxu1 %v2885_v36  ;;  %v2969_v35 = vld [vmem:[#allocation5 + $0x46c] ss:$16 sps:$4 sm:$0xff]   ;;  %v2964_v36 = vld [vmem:[#allocation5 + $0x460] ss:$16 sps:$4 sm:$0xff]  }
  0x8d   :  { %1725 = vmatpush1.bf16.msra.mxu0 %v2880_v37  ;;  %1889 = vmatpush1.bf16.msra.mxu1 %v2883_v38  ;;  %v2967_v37 = vld [vmem:[#allocation5 + $0x468] ss:$16 sps:$4 sm:$0xff]   ;;  %v2972_v38 = vld [vmem:[#allocation5 + $0x484] ss:$16 sps:$4 sm:$0xff]  }
  0x8e   :  { %1726 = vmatprep.subr.bf16.mxu0 %v2888_v39  ;;  %1890 = vmatprep.subr.bf16.mxu1 %v2891_v40  ;;  %v2975_v39 = vld [vmem:[#allocation5 + $0x48c] ss:$16 sps:$4 sm:$0xff]   ;;  %v2970_v40 = vld [vmem:[#allocation5 + $0x480] ss:$16 sps:$4 sm:$0xff]  }
  0x91   :  { %1727 = vmatpush1.bf16.msra.mxu0 %v2886_v41  ;;  %1891 = vmatpush1.bf16.msra.mxu1 %v2889_v42  ;;  %v2973_v41 = vld [vmem:[#allocation5 + $0x488] ss:$16 sps:$4 sm:$0xff]   ;;  %v2978_v42 = vld [vmem:[#allocation5 + $0x4a4] ss:$16 sps:$4 sm:$0xff]  }
  0x92   :  { %1728 = vmatprep.subr.bf16.mxu0 %v2894_v44  ;;  %1892 = vmatprep.subr.bf16.mxu1 %v2897_v45  ;;  %v2981_v44 = vld [vmem:[#allocation5 + $0x4ac] ss:$16 sps:$4 sm:$0xff]   ;;  %v2976_v45 = vld [vmem:[#allocation5 + $0x4a0] ss:$16 sps:$4 sm:$0xff]  }
  0x95   :  { %1729 = vmatpush1.bf16.msra.mxu0 %v2892_v46  ;;  %1893 = vmatpush1.bf16.msra.mxu1 %v2895_v47  ;;  %v2979_v46 = vld [vmem:[#allocation5 + $0x4a8] ss:$16 sps:$4 sm:$0xff]   ;;  %v2984_v47 = vld [vmem:[#allocation5 + $0x4c4] ss:$16 sps:$4 sm:$0xff]  }
  0x96   :  { %1730 = vmatprep.subr.bf16.mxu0 %v2900_v48  ;;  %1894 = vmatprep.subr.bf16.mxu1 %v2903_v50  ;;  %v2987_v48 = vld [vmem:[#allocation5 + $0x4cc] ss:$16 sps:$4 sm:$0xff]   ;;  %v2982_v50 = vld [vmem:[#allocation5 + $0x4c0] ss:$16 sps:$4 sm:$0xff]  }
  0x99   :  { %1731 = vmatpush1.bf16.msra.mxu0 %v2898_v51  ;;  %1895 = vmatpush1.bf16.msra.mxu1 %v2901_v52  ;;  %v2985_v51 = vld [vmem:[#allocation5 + $0x4c8] ss:$16 sps:$4 sm:$0xff]   ;;  %v2990_v52 = vld [vmem:[#allocation5 + $0x4e4] ss:$16 sps:$4 sm:$0xff]  }
  0x9a   :  { %1732 = vmatprep.subr.bf16.mxu0 %v2906_v53  ;;  %1896 = vmatprep.subr.bf16.mxu1 %v2909_v54  ;;  %v2993_v53 = vld [vmem:[#allocation5 + $0x4ec] ss:$16 sps:$4 sm:$0xff]   ;;  %v2988_v54 = vld [vmem:[#allocation5 + $0x4e0] ss:$16 sps:$4 sm:$0xff]  }
  0x9d   :  { %1733 = vmatpush1.bf16.msra.mxu0 %v2904_v55  ;;  %1897 = vmatpush1.bf16.msra.mxu1 %v2907_v56  ;;  %v2991_v55 = vld [vmem:[#allocation5 + $0x4e8] ss:$16 sps:$4 sm:$0xff]   ;;  %v2996_v56 = vld [vmem:[#allocation5 + $0x504] ss:$16 sps:$4 sm:$0xff]  }
  0x9e   :  { %1734 = vmatprep.subr.bf16.mxu0 %v2912_v57  ;;  %1898 = vmatprep.subr.bf16.mxu1 %v2915_v58  ;;  %v2999_v57 = vld [vmem:[#allocation5 + $0x50c] ss:$16 sps:$4 sm:$0xff]   ;;  %v2994_v58 = vld [vmem:[#allocation5 + $0x500] ss:$16 sps:$4 sm:$0xff]  }
  0xa1   :  { %1735 = vmatpush1.bf16.msra.mxu0 %v2910_v59  ;;  %1899 = vmatpush1.bf16.msra.mxu1 %v2913_v60  ;;  %v2997_v59 = vld [vmem:[#allocation5 + $0x508] ss:$16 sps:$4 sm:$0xff]   ;;  %v3002_v60 = vld [vmem:[#allocation5 + $0x524] ss:$16 sps:$4 sm:$0xff]  }
  0xa2   :  { %1736 = vmatprep.subr.bf16.mxu0 %v2918_v61  ;;  %1900 = vmatprep.subr.bf16.mxu1 %v2921_v62  ;;  %v3005_v61 = vld [vmem:[#allocation5 + $0x52c] ss:$16 sps:$4 sm:$0xff]   ;;  %v3000_v62 = vld [vmem:[#allocation5 + $0x520] ss:$16 sps:$4 sm:$0xff]  }
  0xa5   :  { %1737 = vmatpush1.bf16.msra.mxu0 %v2916_v63  ;;  %1901 = vmatpush1.bf16.msra.mxu1 %v2919_v0  ;;  %v3003_v63 = vld [vmem:[#allocation5 + $0x528] ss:$16 sps:$4 sm:$0xff]   ;;  %v3008_v0 = vld [vmem:[#allocation5 + $0x544] ss:$16 sps:$4 sm:$0xff]  }
  0xa6   :  { %1738 = vmatprep.subr.bf16.mxu0 %v2924_v1  ;;  %1902 = vmatprep.subr.bf16.mxu1 %v2927_v2  ;;  %v3011_v1 = vld [vmem:[#allocation5 + $0x54c] ss:$16 sps:$4 sm:$0xff]   ;;  %v3006_v2 = vld [vmem:[#allocation5 + $0x540] ss:$16 sps:$4 sm:$0xff]  }
  0xa9   :  { %1739 = vmatpush1.bf16.msra.mxu0 %v2922_v3  ;;  %1903 = vmatpush1.bf16.msra.mxu1 %v2925_v4  ;;  %v3009_v3 = vld [vmem:[#allocation5 + $0x548] ss:$16 sps:$4 sm:$0xff]   ;;  %v3014_v4 = vld [vmem:[#allocation5 + $0x564] ss:$16 sps:$4 sm:$0xff]  }
  0xaa   :  { %1740 = vmatprep.subr.bf16.mxu0 %v2930_v5  ;;  %1904 = vmatprep.subr.bf16.mxu1 %v2933_v6  ;;  %v3017_v5 = vld [vmem:[#allocation5 + $0x56c] ss:$16 sps:$4 sm:$0xff]   ;;  %v3012_v6 = vld [vmem:[#allocation5 + $0x560] ss:$16 sps:$4 sm:$0xff]  }
  0xad   :  { %1741 = vmatpush1.bf16.msra.mxu0 %v2928_v7  ;;  %1905 = vmatpush1.bf16.msra.mxu1 %v2931_v8  ;;  %v3015_v7 = vld [vmem:[#allocation5 + $0x568] ss:$16 sps:$4 sm:$0xff]   ;;  %v3020_v8 = vld [vmem:[#allocation5 + $0x584] ss:$16 sps:$4 sm:$0xff]  }
  0xae   :  { %1742 = vmatprep.subr.bf16.mxu0 %v2936_v10  ;;  %1906 = vmatprep.subr.bf16.mxu1 %v2939_v11  ;;  %v3023_v10 = vld [vmem:[#allocation5 + $0x58c] ss:$16 sps:$4 sm:$0xff]   ;;  %v3018_v11 = vld [vmem:[#allocation5 + $0x580] ss:$16 sps:$4 sm:$0xff]  }
  0xb1   :  { %1743 = vmatpush1.bf16.msra.mxu0 %v2934_v12  ;;  %1907 = vmatpush1.bf16.msra.mxu1 %v2937_v13  ;;  %v3021_v12 = vld [vmem:[#allocation5 + $0x588] ss:$16 sps:$4 sm:$0xff]   ;;  %v3026_v13 = vld [vmem:[#allocation5 + $0x5a4] ss:$16 sps:$4 sm:$0xff]  }
  0xb2   :  { %1744 = vmatprep.subr.bf16.mxu0 %v2942_v14  ;;  %1908 = vmatprep.subr.bf16.mxu1 %v2945_v15  ;;  %v3029_v14 = vld [vmem:[#allocation5 + $0x5ac] ss:$16 sps:$4 sm:$0xff]   ;;  %v3024_v15 = vld [vmem:[#allocation5 + $0x5a0] ss:$16 sps:$4 sm:$0xff]  }
  0xb5   :  { %1745 = vmatpush1.bf16.msra.mxu0 %v2940_v16  ;;  %1909 = vmatpush1.bf16.msra.mxu1 %v2943_v17  ;;  %v3027_v16 = vld [vmem:[#allocation5 + $0x5a8] ss:$16 sps:$4 sm:$0xff]   ;;  %v3032_v17 = vld [vmem:[#allocation5 + $0x5c4] ss:$16 sps:$4 sm:$0xff]  }
  0xb6   :  { %1755 = vmatprep.subr.bf16.mxu0 %v2948_v18  ;;  %1919 = vmatprep.subr.bf16.mxu1 %v2951_v19  ;;  %v3035_v18 = vld [vmem:[#allocation5 + $0x5cc] ss:$16 sps:$4 sm:$0xff]   ;;  %v3030_v19 = vld [vmem:[#allocation5 + $0x5c0] ss:$16 sps:$4 sm:$0xff]  }
  0xb8   :  { %1747 = vmatmul.mubr.bf16.vlgmr.msra.gmra.mrb[0].mxu0 %v109_v21  ;;  %1911 = vmatmul.mubr.bf16.vlgmr.msra.gmra.mrb[0].mxu1 %v109_v21  ;;  %v3033_v21 = vld [vmem:[#allocation5 + $0x5c8] ss:$16 sps:$4 sm:$0xff]  }
  0xb9   :  { %1756 = vmatpush1.bf16.msra.mxu0 %v2946_v20  ;;  %1920 = vmatpush1.bf16.msra.mxu1 %v2949_v22  ;;  %v82_v20 = vcombine.high %v3355_v23, %v3355_v23  ;;  %v3038_v22 = vld [vmem:[#allocation5 + $0x5e4] ss:$16 sps:$4 sm:$0xff]  }
  0xba   :  { %1757 = vmatprep.subr.bf16.mxu0 %v2954_v24  ;;  %1921 = vmatprep.subr.bf16.mxu1 %v2957_v25  ;;  %v3041_v24 = vld [vmem:[#allocation5 + $0x5ec] ss:$16 sps:$4 sm:$0xff]   ;;  %v3036_v25 = vld [vmem:[#allocation5 + $0x5e0] ss:$16 sps:$4 sm:$0xff]  }
  0xbb   :  { %1787 = vmatprep.mubr.bf16.mxu0 %v112_v31  ;;  %1951 = vmatprep.mubr.bf16.mxu1 %v112_v31  ;;  %v3366_v27 = vrot.slane %v82_v20, %v3345_v49  ;;  %v3045_v31 = vld [vmem:[#allocation5 + $0x608] ss:$16 sps:$4 sm:$0xff]   ;;  %v3053_v49 = vld [vmem:[#allocation5 + $0x62c] ss:$16 sps:$4 sm:$0xff]  }
  0xbc   :  { %v3125_v20 = vld [vmem:[#allocation5 + $0x7ac] ss:$16 sps:$4 sm:$0xff]  }
  0xbd   :  { %1758 = vmatpush1.bf16.msra.mxu0 %v2952_v9  ;;  %1922 = vmatpush1.bf16.msra.mxu1 %v2955_v28  ;;  %v3039_v9 = vld [vmem:[#allocation5 + $0x5e8] ss:$16 sps:$4 sm:$0xff]   ;;  %v3044_v28 = vld [vmem:[#allocation5 + $0x604] ss:$16 sps:$4 sm:$0xff]   ;;  %v98_v23 = vcombine.high %v3366_v27, %v3366_v27 }
  0xbe   :  { %1759 = vmatprep.subr.bf16.mxu0 %v2960_v29  ;;  %1923 = vmatprep.subr.bf16.mxu1 %v2963_v30  ;;  %v3047_v29 = vld [vmem:[#allocation5 + $0x60c] ss:$16 sps:$4 sm:$0xff]   ;;  %v3042_v30 = vld [vmem:[#allocation5 + $0x600] ss:$16 sps:$4 sm:$0xff]  }
  0xc1   :  { %1760 = vmatpush1.bf16.msra.mxu0 %v2958_v32  ;;  %1924 = vmatpush1.bf16.msra.mxu1 %v2961_v33  ;;  %v111_v32 = vpack.c.bf16 %v3359_v26, %v3359_v26  ;;  %v3050_v33 = vld [vmem:[#allocation5 + $0x624] ss:$16 sps:$4 sm:$0xff]  }
  0xc2   :  { %1761 = vmatprep.subr.bf16.mxu0 %v2966_v34  ;;  %1925 = vmatprep.subr.bf16.mxu1 %v2969_v35  ;;  %v114_v34 = vpack.c.bf16 %v98_v23, %v98_v23  ;;  %v3048_v35 = vld [vmem:[#allocation5 + $0x620] ss:$16 sps:$4 sm:$0xff]   ;;  %v3062_v26 = vld [vmem:[#allocation5 + $0x664] ss:$16 sps:$4 sm:$0xff]  }
  0xc3   :  { %v3132_v23 = vld [vmem:[#allocation5 + $0x7e0] ss:$16 sps:$4 sm:$0xff]  }
  0xc5   :  { %1762 = vmatpush1.bf16.msra.mxu0 %v2964_v36  ;;  %1926 = vmatpush1.bf16.msra.mxu1 %v2967_v37  ;;  %v3051_v36 = vld [vmem:[#allocation5 + $0x628] ss:$16 sps:$4 sm:$0xff]   ;;  %v3056_v37 = vld [vmem:[#allocation5 + $0x644] ss:$16 sps:$4 sm:$0xff]  }
  0xc6   :  { %1763 = vmatprep.subr.bf16.mxu0 %v2972_v38  ;;  %1927 = vmatprep.subr.bf16.mxu1 %v2975_v39  ;;  %v3059_v38 = vld [vmem:[#allocation5 + $0x64c] ss:$16 sps:$4 sm:$0xff]   ;;  %v3054_v39 = vld [vmem:[#allocation5 + $0x640] ss:$16 sps:$4 sm:$0xff]  }
  0xc9   :  { %1764 = vmatpush1.bf16.msra.mxu0 %v2970_v40  ;;  %1928 = vmatpush1.bf16.msra.mxu1 %v2973_v41  ;;  %v3057_v40 = vld [vmem:[#allocation5 + $0x648] ss:$16 sps:$4 sm:$0xff]   ;;  %v3065_v41 = vld [vmem:[#allocation5 + $0x66c] ss:$16 sps:$4 sm:$0xff]  }
  0xca   :  { %1765 = vmatprep.subr.bf16.mxu0 %v2978_v42  ;;  %1929 = vmatprep.subr.bf16.mxu1 %v2981_v44  ;;  %v3060_v42 = vld [vmem:[#allocation5 + $0x660] ss:$16 sps:$4 sm:$0xff]   ;;  %v3063_v44 = vld [vmem:[#allocation5 + $0x668] ss:$16 sps:$4 sm:$0xff]  }
  0xcd   :  { %1766 = vmatpush1.bf16.msra.mxu0 %v2976_v45  ;;  %1930 = vmatpush1.bf16.msra.mxu1 %v2979_v46  ;;  %v3068_v45 = vld [vmem:[#allocation5 + $0x684] ss:$16 sps:$4 sm:$0xff]   ;;  %v3071_v46 = vld [vmem:[#allocation5 + $0x68c] ss:$16 sps:$4 sm:$0xff]  }
  0xce   :  { %1767 = vmatprep.subr.bf16.mxu0 %v2984_v47  ;;  %1931 = vmatprep.subr.bf16.mxu1 %v2987_v48  ;;  %v3066_v47 = vld [vmem:[#allocation5 + $0x680] ss:$16 sps:$4 sm:$0xff]   ;;  %v3069_v48 = vld [vmem:[#allocation5 + $0x688] ss:$16 sps:$4 sm:$0xff]  }
  0xd1   :  { %1768 = vmatpush1.bf16.msra.mxu0 %v2982_v50  ;;  %1932 = vmatpush1.bf16.msra.mxu1 %v2985_v51  ;;  %v3074_v50 = vld [vmem:[#allocation5 + $0x6a4] ss:$16 sps:$4 sm:$0xff]   ;;  %v3077_v51 = vld [vmem:[#allocation5 + $0x6ac] ss:$16 sps:$4 sm:$0xff]  }
  0xd2   :  { %1769 = vmatprep.subr.bf16.mxu0 %v2990_v52  ;;  %1933 = vmatprep.subr.bf16.mxu1 %v2993_v53  ;;  %v3072_v52 = vld [vmem:[#allocation5 + $0x6a0] ss:$16 sps:$4 sm:$0xff]   ;;  %v3075_v53 = vld [vmem:[#allocation5 + $0x6a8] ss:$16 sps:$4 sm:$0xff]  }
  0xd5   :  { %1770 = vmatpush1.bf16.msra.mxu0 %v2988_v54  ;;  %1934 = vmatpush1.bf16.msra.mxu1 %v2991_v55  ;;  %v3080_v54 = vld [vmem:[#allocation5 + $0x6c4] ss:$16 sps:$4 sm:$0xff]   ;;  %v3083_v55 = vld [vmem:[#allocation5 + $0x6cc] ss:$16 sps:$4 sm:$0xff]  }
  0xd6   :  { %1771 = vmatprep.subr.bf16.mxu0 %v2996_v56  ;;  %1935 = vmatprep.subr.bf16.mxu1 %v2999_v57  ;;  %v3078_v56 = vld [vmem:[#allocation5 + $0x6c0] ss:$16 sps:$4 sm:$0xff]   ;;  %v3081_v57 = vld [vmem:[#allocation5 + $0x6c8] ss:$16 sps:$4 sm:$0xff]  }
  0xd9   :  { %1772 = vmatpush1.bf16.msra.mxu0 %v2994_v58  ;;  %1936 = vmatpush1.bf16.msra.mxu1 %v2997_v59  ;;  %v3086_v58 = vld [vmem:[#allocation5 + $0x6e4] ss:$16 sps:$4 sm:$0xff]   ;;  %v3089_v59 = vld [vmem:[#allocation5 + $0x6ec] ss:$16 sps:$4 sm:$0xff]  }
  0xda   :  { %1773 = vmatprep.subr.bf16.mxu0 %v3002_v60  ;;  %1937 = vmatprep.subr.bf16.mxu1 %v3005_v61  ;;  %v3084_v60 = vld [vmem:[#allocation5 + $0x6e0] ss:$16 sps:$4 sm:$0xff]   ;;  %v3087_v61 = vld [vmem:[#allocation5 + $0x6e8] ss:$16 sps:$4 sm:$0xff]  }
  0xdd   :  { %1774 = vmatpush1.bf16.msra.mxu0 %v3000_v62  ;;  %1938 = vmatpush1.bf16.msra.mxu1 %v3003_v63  ;;  %v3092_v62 = vld [vmem:[#allocation5 + $0x704] ss:$16 sps:$4 sm:$0xff]   ;;  %v3095_v63 = vld [vmem:[#allocation5 + $0x70c] ss:$16 sps:$4 sm:$0xff]  }
  0xde   :  { %1775 = vmatprep.subr.bf16.mxu0 %v3008_v0  ;;  %1939 = vmatprep.subr.bf16.mxu1 %v3011_v1  ;;  %v3090_v0 = vld [vmem:[#allocation5 + $0x700] ss:$16 sps:$4 sm:$0xff]   ;;  %v3093_v1 = vld [vmem:[#allocation5 + $0x708] ss:$16 sps:$4 sm:$0xff]  }
  0xe1   :  { %1776 = vmatpush1.bf16.msra.mxu0 %v3006_v2  ;;  %1940 = vmatpush1.bf16.msra.mxu1 %v3009_v3  ;;  %v3098_v2 = vld [vmem:[#allocation5 + $0x724] ss:$16 sps:$4 sm:$0xff]   ;;  %v3101_v3 = vld [vmem:[#allocation5 + $0x72c] ss:$16 sps:$4 sm:$0xff]  }
  0xe2   :  { %1777 = vmatprep.subr.bf16.mxu0 %v3014_v4  ;;  %1941 = vmatprep.subr.bf16.mxu1 %v3017_v5  ;;  %v3096_v4 = vld [vmem:[#allocation5 + $0x720] ss:$16 sps:$4 sm:$0xff]   ;;  %v3099_v5 = vld [vmem:[#allocation5 + $0x728] ss:$16 sps:$4 sm:$0xff]  }
  0xe5   :  { %1778 = vmatpush1.bf16.msra.mxu0 %v3012_v6  ;;  %1942 = vmatpush1.bf16.msra.mxu1 %v3015_v7  ;;  %v3104_v6 = vld [vmem:[#allocation5 + $0x744] ss:$16 sps:$4 sm:$0xff]   ;;  %v3107_v7 = vld [vmem:[#allocation5 + $0x74c] ss:$16 sps:$4 sm:$0xff]  }
  0xe6   :  { %1779 = vmatprep.subr.bf16.mxu0 %v3020_v8  ;;  %1943 = vmatprep.subr.bf16.mxu1 %v3023_v10  ;;  %v3102_v8 = vld [vmem:[#allocation5 + $0x740] ss:$16 sps:$4 sm:$0xff]   ;;  %v3105_v10 = vld [vmem:[#allocation5 + $0x748] ss:$16 sps:$4 sm:$0xff]  }
  0xe9   :  { %1780 = vmatpush1.bf16.msra.mxu0 %v3018_v11  ;;  %1944 = vmatpush1.bf16.msra.mxu1 %v3021_v12  ;;  %v3110_v11 = vld [vmem:[#allocation5 + $0x764] ss:$16 sps:$4 sm:$0xff]   ;;  %v3113_v12 = vld [vmem:[#allocation5 + $0x76c] ss:$16 sps:$4 sm:$0xff]  }
  0xea   :  { %1781 = vmatprep.subr.bf16.mxu0 %v3026_v13  ;;  %1945 = vmatprep.subr.bf16.mxu1 %v3029_v14  ;;  %v3108_v13 = vld [vmem:[#allocation5 + $0x760] ss:$16 sps:$4 sm:$0xff]   ;;  %v3111_v14 = vld [vmem:[#allocation5 + $0x768] ss:$16 sps:$4 sm:$0xff]  }
  0xed   :  { %1782 = vmatpush1.bf16.msra.mxu0 %v3024_v15  ;;  %1946 = vmatpush1.bf16.msra.mxu1 %v3027_v16  ;;  %v3116_v15 = vld [vmem:[#allocation5 + $0x784] ss:$16 sps:$4 sm:$0xff]   ;;  %v3119_v16 = vld [vmem:[#allocation5 + $0x78c] ss:$16 sps:$4 sm:$0xff]  }
  0xee   :  { %1783 = vmatprep.subr.bf16.mxu0 %v3032_v17  ;;  %1947 = vmatprep.subr.bf16.mxu1 %v3035_v18  ;;  %v3114_v17 = vld [vmem:[#allocation5 + $0x780] ss:$16 sps:$4 sm:$0xff]   ;;  %v3117_v18 = vld [vmem:[#allocation5 + $0x788] ss:$16 sps:$4 sm:$0xff]  }
  0xf1   :  { %1784 = vmatpush1.bf16.msra.mxu0 %v3030_v19  ;;  %1948 = vmatpush1.bf16.msra.mxu1 %v3033_v21  ;;  %v3122_v19 = vld [vmem:[#allocation5 + $0x7a4] ss:$16 sps:$4 sm:$0xff]   ;;  %v3120_v21 = vld [vmem:[#allocation5 + $0x7a0] ss:$16 sps:$4 sm:$0xff]  }
  0xf2   :  { %1785 = vmatprep.subr.bf16.mxu0 %v3038_v22  ;;  %1949 = vmatprep.subr.bf16.mxu1 %v3041_v24  ;;  %v3123_v22 = vld [vmem:[#allocation5 + $0x7a8] ss:$16 sps:$4 sm:$0xff]   ;;  %v3128_v24 = vld [vmem:[#allocation5 + $0x7c4] ss:$16 sps:$4 sm:$0xff]  }
  0xf5   :  { %1786 = vmatpush1.bf16.msra.mxu0 %v3036_v25  ;;  %1950 = vmatpush1.bf16.msra.mxu1 %v3039_v9  ;;  %v3131_v25 = vld [vmem:[#allocation5 + $0x7cc] ss:$16 sps:$4 sm:$0xff]   ;;  %v3126_v9 = vld [vmem:[#allocation5 + $0x7c0] ss:$16 sps:$4 sm:$0xff]  }
  0xf6   :  { %1796 = vmatprep.subr.bf16.mxu0 %v3044_v28  ;;  %1960 = vmatprep.subr.bf16.mxu1 %v3047_v29  ;;  %v3129_v28 = vld [vmem:[#allocation5 + $0x7c8] ss:$16 sps:$4 sm:$0xff]   ;;  %v3134_v29 = vld [vmem:[#allocation5 + $0x7e4] ss:$16 sps:$4 sm:$0xff]  }
  0xf8   :  { %1788 = vmatmul.mubr.bf16.vlgmr.msra.gmra.mrb[0].mxu0 %v111_v32  ;;  %1952 = vmatmul.mubr.bf16.vlgmr.msra.gmra.mrb[0].mxu1 %v111_v32  ;;  %v3139_v32 = vld [vmem:[#allocation7 + $0x40] sm:$0xff]  }
  0xf9   :  { %1797 = vmatpush1.bf16.msra.mxu0 %v3042_v30  ;;  %1961 = vmatpush1.bf16.msra.mxu1 %v3045_v31  ;;  %v3137_v30 = vld [vmem:[#allocation5 + $0x7ec] ss:$16 sps:$4 sm:$0xff]   ;;  %v3135_v31 = vld [vmem:[#allocation5 + $0x7e8] ss:$16 sps:$4 sm:$0xff]  }
  0xfa   :  { %1798 = vmatprep.subr.bf16.mxu0 %v3050_v33  ;;  %1962 = vmatprep.subr.bf16.mxu1 %v3053_v49  ;;  %v3140_v33 = vld [vmem:[#allocation7 + $0xc0] sm:$0xff]   ;;  %v113_v49 = vpack.c.bf16 %v3366_v27, %v3366_v27  ;;  %v3149_v27 = vld [vmem:[#allocation7 + $0x10] sm:$0xff]  }
  0xfb   :  { %1828 = vmatprep.mubr.bf16.mxu0 %v114_v34  ;;  %1992 = vmatprep.mubr.bf16.mxu1 %v114_v34  ;;  %v3141_v34 = vld [vmem:[#allocation7] sm:$0xff]  }
  0xfd   :  { %1799 = vmatpush1.bf16.msra.mxu0 %v3048_v35  ;;  %1963 = vmatpush1.bf16.msra.mxu1 %v3051_v36  ;;  %v3142_v35 = vld [vmem:[#allocation7 + $0x80] sm:$0xff]   ;;  %v3143_v36 = vld [vmem:[#allocation7 + $0x48] sm:$0xff]  }
  0xfe   :  { %1800 = vmatprep.subr.bf16.mxu0 %v3056_v37  ;;  %1964 = vmatprep.subr.bf16.mxu1 %v3059_v38  ;;  %v3144_v37 = vld [vmem:[#allocation7 + $0xc8] sm:$0xff]  }
  0xff   :  { %v3145_v38 = vld [vmem:[#allocation7 + $0x8] sm:$0xff]  }
 0x101   :  { %1801 = vmatpush1.bf16.msra.mxu0 %v3054_v39  ;;  %1965 = vmatpush1.bf16.msra.mxu1 %v3057_v40  ;;  %v3146_v39 = vld [vmem:[#allocation7 + $0x88] sm:$0xff]   ;;  %v3147_v40 = vld [vmem:[#allocation7 + $0x50] sm:$0xff]  }
 0x102   :  { %1802 = vmatprep.subr.bf16.mxu0 %v3062_v26  ;;  %1966 = vmatprep.subr.bf16.mxu1 %v3065_v41  ;;  %v3148_v26 = vld [vmem:[#allocation7 + $0xd0] sm:$0xff]  }
 0x103   :  { %v3150_v41 = vld [vmem:[#allocation7 + $0x90] sm:$0xff]  }
 0x105   :  { %1803 = vmatpush1.bf16.msra.mxu0 %v3060_v42  ;;  %1967 = vmatpush1.bf16.msra.mxu1 %v3063_v44  ;;  %v3151_v42 = vld [vmem:[#allocation7 + $0x58] sm:$0xff]  }
 0x106   :  { %1804 = vmatprep.subr.bf16.mxu0 %v3068_v45  ;;  %1968 = vmatprep.subr.bf16.mxu1 %v3071_v46  ;;  %v3152_v44 = vld [vmem:[#allocation7 + $0xd8] sm:$0xff]  }
 0x107   :  { %v3153_v45 = vld [vmem:[#allocation7 + $0x18] sm:$0xff]  }
 0x108   :  { %v3154_v46 = vld [vmem:[#allocation7 + $0x98] sm:$0xff]  }
 0x109   :  { %1805 = vmatpush1.bf16.msra.mxu0 %v3066_v47  ;;  %1969 = vmatpush1.bf16.msra.mxu1 %v3069_v48  ;;  %v3155_v47 = vld [vmem:[#allocation7 + $0x60] sm:$0xff]  }
 0x10a   :  { %1806 = vmatprep.subr.bf16.mxu0 %v3074_v50  ;;  %1970 = vmatprep.subr.bf16.mxu1 %v3077_v51  ;;  %v3156_v48 = vld [vmem:[#allocation7 + $0xe0] sm:$0xff]  }
 0x10b   :  { %v3157_v50 = vld [vmem:[#allocation7 + $0x20] sm:$0xff]  }
 0x10c   :  { %v3158_v51 = vld [vmem:[#allocation7 + $0xa0] sm:$0xff]  }
 0x10d   :  { %1807 = vmatpush1.bf16.msra.mxu0 %v3072_v52  ;;  %1971 = vmatpush1.bf16.msra.mxu1 %v3075_v53  ;;  %v3159_v52 = vld [vmem:[#allocation7 + $0x68] sm:$0xff]  }
 0x10e   :  { %1808 = vmatprep.subr.bf16.mxu0 %v3080_v54  ;;  %1972 = vmatprep.subr.bf16.mxu1 %v3083_v55  ;;  %v3160_v53 = vld [vmem:[#allocation7 + $0xe8] sm:$0xff]  }
 0x10f   :  { %v3161_v54 = vld [vmem:[#allocation7 + $0x28] sm:$0xff]  }
 0x110   :  { %v3162_v55 = vld [vmem:[#allocation7 + $0xa8] sm:$0xff]  }
 0x111   :  { %1809 = vmatpush1.bf16.msra.mxu0 %v3078_v56  ;;  %1973 = vmatpush1.bf16.msra.mxu1 %v3081_v57  ;;  %v3163_v56 = vld [vmem:[#allocation7 + $0x70] sm:$0xff]  }
 0x112   :  { %1810 = vmatprep.subr.bf16.mxu0 %v3086_v58  ;;  %1974 = vmatprep.subr.bf16.mxu1 %v3089_v59  ;;  %v3164_v57 = vld [vmem:[#allocation7 + $0xf0] sm:$0xff]  }
 0x113   :  { %v3165_v58 = vld [vmem:[#allocation7 + $0x30] sm:$0xff]  }
 0x114   :  { %v3166_v59 = vld [vmem:[#allocation7 + $0xb0] sm:$0xff]  }
 0x115   :  { %1811 = vmatpush1.bf16.msra.mxu0 %v3084_v60  ;;  %1975 = vmatpush1.bf16.msra.mxu1 %v3087_v61  ;;  %v3167_v60 = vld [vmem:[#allocation7 + $0x78] sm:$0xff]  }
 0x116   :  { %1812 = vmatprep.subr.bf16.mxu0 %v3092_v62  ;;  %1976 = vmatprep.subr.bf16.mxu1 %v3095_v63  ;;  %v3168_v61 = vld [vmem:[#allocation7 + $0xf8] sm:$0xff]  }
 0x117   :  { %v3169_v62 = vld [vmem:[#allocation7 + $0x38] sm:$0xff]  }
 0x118   :  { %v3170_v63 = vld [vmem:[#allocation7 + $0xb8] sm:$0xff]  }
 0x119   :  { %1813 = vmatpush1.bf16.msra.mxu0 %v3090_v0  ;;  %1977 = vmatpush1.bf16.msra.mxu1 %v3093_v1  ;;  %v375_v0 = vsub.s32 0, %v3342_v43  ;;  %v383_v1 = vsub.s32 2, %v3342_v43 }
 0x11a   :  { %1814 = vmatprep.subr.bf16.mxu0 %v3098_v2  ;;  %1978 = vmatprep.subr.bf16.mxu1 %v3101_v3  ;;  %v371_v2 = vld [vmem:[%s3402_s2] sm:$0xf]  ;;  %v379_v3 = vsub.s32 1, %v3342_v43 }
 0x11d   :  { %1815 = vmatpush1.bf16.msra.mxu0 %v3096_v4  ;;  %1979 = vmatpush1.bf16.msra.mxu1 %v3099_v5  ;;  %v387_v4 = vsub.s32 3, %v3342_v43  ;;  %v376_v5 = vrot.slane %v371_v2, %v375_v0 }
 0x11e   :  { %1816 = vmatprep.subr.bf16.mxu0 %v3104_v6  ;;  %1980 = vmatprep.subr.bf16.mxu1 %v3107_v7  ;;  %v384_v6 = vrot.slane %v371_v2, %v383_v1  ;;  %v380_v7 = vrot.slane %v371_v2, %v379_v3 }
 0x121   :  { %1817 = vmatpush1.bf16.msra.mxu0 %v3102_v8  ;;  %1981 = vmatpush1.bf16.msra.mxu1 %v3105_v10  ;;  %v388_v8 = vrot.slane %v371_v2, %v387_v4 }
 0x122   :  { %1818 = vmatprep.subr.bf16.mxu0 %v3110_v11  ;;  %1982 = vmatprep.subr.bf16.mxu1 %v3113_v12 }
 0x125   :  { %1819 = vmatpush1.bf16.msra.mxu0 %v3108_v13  ;;  %1983 = vmatpush1.bf16.msra.mxu1 %v3111_v14 }
 0x126   :  { %1820 = vmatprep.subr.bf16.mxu0 %v3116_v15  ;;  %1984 = vmatprep.subr.bf16.mxu1 %v3119_v16 }
 0x129   :  { %1821 = vmatpush1.bf16.msra.mxu0 %v3114_v17  ;;  %1985 = vmatpush1.bf16.msra.mxu1 %v3117_v18 }
 0x12a   :  { %1822 = vmatprep.subr.bf16.mxu0 %v3122_v19  ;;  %1986 = vmatprep.subr.bf16.mxu1 %v3125_v20 }
 0x12d   :  { %1823 = vmatpush1.bf16.msra.mxu0 %v3120_v21  ;;  %1987 = vmatpush1.bf16.msra.mxu1 %v3123_v22 }
 0x12e   :  { %1824 = vmatprep.subr.bf16.mxu0 %v3128_v24  ;;  %1988 = vmatprep.subr.bf16.mxu1 %v3131_v25 }
 0x131   :  { %1825 = vmatpush1.bf16.msra.mxu0 %v3126_v9  ;;  %1989 = vmatpush1.bf16.msra.mxu1 %v3129_v28 }
 0x132   :  { %1826 = vmatprep.subr.bf16.mxu0 %v3134_v29  ;;  %1990 = vmatprep.subr.bf16.mxu1 %v3137_v30 }
 0x135   :  { %1827 = vmatpush1.bf16.msra.mxu0 %v3132_v23  ;;  %1991 = vmatpush1.bf16.msra.mxu1 %v3135_v31 }
 0x136   :  { %2672 = vmatprep.subr.bf16.mxu0 %v3139_v32  ;;  %2694 = vmatprep.subr.bf16.mxu1 %v3140_v33 }
 0x138   :  { %1829 = vmatmul.mubr.bf16.vlgmr.msra.gmra.mrb[0].mxu0 %v113_v49  ;;  %1993 = vmatmul.mubr.bf16.vlgmr.msra.gmra.mrb[0].mxu1 %v113_v49 }
 0x139   :  { %2673 = vmatpush3.bf16.msra.mxu0 %v3141_v34  ;;  %2695 = vmatpush3.bf16.msra.mxu1 %v3142_v35 }
 0x13a   :  { %2674 = vmatprep.subr.bf16.mxu0 %v3143_v36  ;;  %2696 = vmatprep.subr.bf16.mxu1 %v3144_v37 }
 0x13d   :  { %2675 = vmatpush3.bf16.msra.mxu0 %v3145_v38  ;;  %2697 = vmatpush3.bf16.msra.mxu1 %v3146_v39 }
 0x13e   :  { %2676 = vmatprep.subr.bf16.mxu0 %v3147_v40  ;;  %2698 = vmatprep.subr.bf16.mxu1 %v3148_v26 }
 0x141   :  { %2677 = vmatpush3.bf16.msra.mxu0 %v3149_v27  ;;  %2699 = vmatpush3.bf16.msra.mxu1 %v3150_v41 }
 0x142   :  { %2678 = vmatprep.subr.bf16.mxu0 %v3151_v42  ;;  %2700 = vmatprep.subr.bf16.mxu1 %v3152_v44 }
 0x145   :  { %2679 = vmatpush3.bf16.msra.mxu0 %v3153_v45  ;;  %2701 = vmatpush3.bf16.msra.mxu1 %v3154_v46 }
 0x146   :  { %2680 = vmatprep.subr.bf16.mxu0 %v3155_v47  ;;  %2702 = vmatprep.subr.bf16.mxu1 %v3156_v48 }
 0x149   :  { %2681 = vmatpush3.bf16.msra.mxu0 %v3157_v50  ;;  %2703 = vmatpush3.bf16.msra.mxu1 %v3158_v51  ;;  %v2671_v50 = vld [vmem:[%s3404_s4] ss:$0 sm:$0xff] }
 0x14a   :  { %2682 = vmatprep.subr.bf16.mxu0 %v3159_v52  ;;  %2704 = vmatprep.subr.bf16.mxu1 %v3160_v53 }
 0x14d   :  { %2683 = vmatpush3.bf16.msra.mxu0 %v3161_v54  ;;  %2705 = vmatpush3.bf16.msra.mxu1 %v3162_v55 }
 0x14e   :  { %2684 = vmatprep.subr.bf16.mxu0 %v3163_v56  ;;  %2706 = vmatprep.subr.bf16.mxu1 %v3164_v57 }
 0x151   :  { %2685 = vmatpush3.bf16.msra.mxu0 %v3165_v58  ;;  %2707 = vmatpush3.bf16.msra.mxu1 %v3166_v59 }
 0x152   :  { %2686 = vmatprep.subr.bf16.mxu0 %v3167_v60  ;;  %2708 = vmatprep.subr.bf16.mxu1 %v3168_v61 }
 0x155   :  { %2687 = vmatpush3.bf16.msra.mxu0 %v3169_v62  ;;  %2709 = vmatpush3.bf16.msra.mxu1 %v3170_v63 }
 0x20b   :  { %v1830_v10 = vpop.f32.mrb[0].mxu0  ;;  %v1994_v11 = vpop.f32.mrb[0].mxu1 }
 0x20c   :  { %v2716_v12 = vadd.f32 %v1830_v10, %v376_v5  ;;  %v2718_v13 = vadd.f32 %v1994_v11, %v384_v6  ;;  %v1832_v14 = vpop.f32.mrb[1].mxu0  ;;  %v1996_v15 = vpop.f32.mrb[1].mxu1 }
 0x20d   :  { %v2717_v16 = vadd.f32 %v1832_v14, %v380_v7  ;;  %v2719_v17 = vadd.f32 %v1996_v15, %v388_v8  ;;  %v1834_v18 = vpop.f32.mrb[2].mxu0  ;;  %v1998_v19 = vpop.f32.mrb[2].mxu1 }
 0x20e   :  { %v2001_v20 = vmul.f32 %v2716_v12, %v2716_v12  ;;  %v1835_v21 = vpop.f32.mrb[3].mxu0  ;;  %v1999_v22 = vpop.f32.mrb[3].mxu1  ;;  %v2003_v24 = vmul.f32 %v2718_v13, %v2718_v13  ;;  %v2017_v29 = vpack.c.bf16 %v2716_v12, %v2716_v12  ;;  %v2019_v30 = vpack.c.bf16 %v2718_v13, %v2718_v13 }
 0x20f   :  { %v2002_v43 = vmul.f32 %v2717_v16, %v2717_v16  ;;  %v2018_v25 = vpack.c.bf16 %v2717_v16, %v2717_v16  ;;  %v2020_v9 = vpack.c.bf16 %v2719_v17, %v2719_v17  ;;  %v2004_v31 = vmul.f32 %v2719_v17, %v2719_v17 }
 0x210   :  { %v2006_v28 = vsel %vm2005_vm0, %v2001_v20, 0.0  ;;  %v2009_v33 = vsel %vm2005_vm0, %v2003_v24, 0.0 }
 0x211   :  { %v2007_v23 = vsel %vm2005_vm0, %v2002_v43, 0.0  ;;  %2309 = vmatprep.mubr.bf16.mxu0 %v2018_v25  ;;  %2349 = vmatprep.mubr.bf16.mxu1 %v2020_v9  ;;  %v2011_v34 = vsel %vm2005_vm0, %v2004_v31, 0.0 }
 0x212   :  { %2310 = vmatmul.mubr.bf16.vlgmr.msra.gmra.mrb[4].mxu0 %v2017_v29  ;;  %2350 = vmatmul.mubr.bf16.vlgmr.msra.gmra.mrb[4].mxu1 %v2019_v30  ;;  %v2008_v32 = vadd.f32 %v2007_v23, %v2006_v28 }
 0x214   :  { %v2010_v49 = vadd.f32 %v2009_v33, %v2008_v32 }
 0x216   :  { %v2012_v35 = vadd.f32 %v2011_v34, %v2010_v49 }
 0x218   :  { %2013 = vadd.xlane.f32.xlu0 %v2012_v35 }
 0x2a5   :  { %v2014_v36 = vpop.xlane.xlu0 %2013 }
 0x2a6   :  { %v2015_v37 = vadd.f32 1e-12, %v2014_v36 }
 0x2a8   :  { %3171 = vrsqrt.f32 %v2015_v37 }
 0x2b2   :  { %v3172_v48 = vpop.eup %3171 }
 0x2e5   :  { %v2688_v38 = vpop.f32.mrb[4].mxu0  ;;  %v2710_v39 = vpop.f32.mrb[4].mxu1 }
 0x2e6   :  { %v2689_v40 = vpop.f32.mrb[5].mxu0  ;;  %v2711_v26 = vpop.f32.mrb[5].mxu1 }
 0x2e7   :  { %v2690_v27 = vadd.f32 %v2689_v40, %v2688_v38  ;;  %v2712_v41 = vadd.f32 %v2711_v26, %v2710_v39  ;;  %v2691_v42 = vpop.f32.mrb[6].mxu0  ;;  %v2713_v44 = vpop.f32.mrb[6].mxu1 }
 0x2e8   :  { %v2692_v45 = vpop.f32.mrb[7].mxu0  ;;  %v2714_v46 = vpop.f32.mrb[7].mxu1 }
 0x2e9   :  { %v2352_v47 = vadd.f32 %v2712_v41, %v2690_v27 }
 0x2eb   :  { %v2357_v51 = vmul.f32 %v3172_v48, %v2352_v47 }
 0x2ed   :  { %v2365_v52 = vadd.f32 %v2671_v50, %v2357_v51 }
 0x2ef   :  { %2366 = vst [vmem:[#allocation8] sm:$0x3] %v2365_v52 }
 0x2f0   :  { %3250 = shalt.err (!%p3247_p0)
}
 0x2f1   :  { %s3251_s13 = scalar_lea.hbm %s3405_s5, 32 }
 0x2f2   :  { %p3252_p1 = scmp.ne.s32.totalorder %s3405_s5, %s3251_s13  ;;  %p3255_p2 = scmp.lt.u32.totalorder %s3251_s13, %s3405_s5 }
 0x2f4   :  { %p3257_p3 = pnand %p3255_p2, %p3252_p1 }
 0x2f6   :  { %3260 = shalt.err (!%p3257_p3)
}
 0x2f7   :  { %2376 = dma.vmem_to_hbm [thread:$0]  %s2374_s9, 32, %s3405_s5, [#allocation4]  }
 0x2f8   :  { %3265 = dma.done.wait [#allocation4], 32  }
 0x2f9   :  { %3266 = vsyncadd [#allocation4], 4294967264 }
 0x2fa   :  { %2380 = vsyncpa [#allocation3], 1 }
 0x2fb   :  { %2381 = vsyncpa [#allocation6], 1 }
 0x2fc   :  { %2382 = vsyncpa [#allocation4], 1 }

</bundles_post_ra>
